<compile_context>
chip_gen: v6e
topology: v6e:2x2x1
jax: 0.10.0
libtpu: 0.0.40
codegen_flags: <defaults>
</compile_context>

<pallas_src>
import functools

import jax
import jax.numpy as jnp
from jax.experimental import pallas as pl
from jax.experimental.pallas import tpu as pltpu


_TARGET_BLOCK_BYTES = 2 * 1024 * 1024    # ~2 MiB of pred per pipeline buffer
_VMEM_BUDGET_BYTES = 40 * 1024 * 1024    # stay well under v7x's 64 MiB / TC
_MAX_TILE_ROWS = 4096


def _round_up(x: int, m: int) -> int:
    return ((x + m - 1) // m) * m


def _sublane_multiple(dtype) -> int:
    # Sub-32-bit dtypes pack 2/4 rows per sublane: second-to-last block dim
    # should be a multiple of 8 (f32), 16 (bf16/f16), 32 (int8/fp8).
    return 8 * max(1, 4 // jnp.dtype(dtype).itemsize)


def _masked_row_loss(z, s, row0, tile_rows, n_valid):
    """Per-row loss log(z) - log(s); rows with global index >= n_valid -> 0."""
    row = jax.lax.broadcasted_iota(jnp.int32, (tile_rows, 1), 0) + row0
    valid = row < n_valid
    z_safe = jnp.where(valid, z, 1.0)
    s_safe = jnp.where(valid, s, 1.0)
    return jnp.where(valid, jnp.log(z_safe) - jnp.log(s_safe), 0.0)


def _lane_dense_partial(partial):
    """Scalar partial sum -> lane-dense (1, 1, 128) block (unmasked store)."""
    lane = jax.lax.broadcasted_iota(jnp.int32, (1, 1, 128), 2)
    return jnp.where(lane == 0, partial, 0.0).astype(jnp.float32)


def _fwd_loss_matmul_kernel(pred_ref, target_ref, T_ref, out_ref, *,
                            n_valid: int, tile_n: int):
    """Small/medium C path: corrected = e @ T on the MXU, select target column."""
    i = pl.program_id(0)

    x = pred_ref[...].astype(jnp.float32)               # [tile_n, C]
    tgt = target_ref[...]                                # [tile_n, 1] int32
    tn, c = x.shape

    # Numerically-stable softmax numerator; denominator folded into the log.
    m = jnp.max(x, axis=-1, keepdims=True)
    e = jnp.exp(x - m)
    z = jnp.sum(e, axis=-1, keepdims=True)               # [tile_n, 1]

    # Unnormalized forward correction on the MXU.  T stays in its source dtype
    # (no per-step f32 upcast of a CxC tile); cast e to bf16 only when T is
    # bf16 so the MXU runs its native bf16 x bf16 -> f32 path.
    T = T_ref[...]
    lhs = e.astype(T.dtype) if T.dtype == jnp.bfloat16 else e
    corrected = jnp.dot(lhs, T, preferred_element_type=jnp.float32)  # [tile_n, C]

    # Select the target entry BEFORE the log: one iota + one compare/select
    # pass over the tile, then a lane reduce.
    col = jax.lax.broadcasted_iota(jnp.int32, (tn, c), 1)
    s = jnp.sum(jnp.where(col == tgt, corrected, 0.0), axis=-1, keepdims=True)

    per_row = _masked_row_loss(z, s, i * tile_n, tn, n_valid)
    out_ref[...] = _lane_dense_partial(jnp.sum(per_row))


def _fwd_loss_gather_kernel(pred_ref, tcols_ref, out_ref, *,
                            n_valid: int, tile_n: int):
    """Large C path: s_i = sum_j e_ij * T[j, target_i] (O(N*C) VPU work)."""
    i = pl.program_id(0)

    x = pred_ref[...].astype(jnp.float32)                # [tile_n, C]
    tcols = tcols_ref[...].astype(jnp.float32)           # [tile_n, C]
    tn, _ = x.shape

    m = jnp.max(x, axis=-1, keepdims=True)
    e = jnp.exp(x - m)
    z = jnp.sum(e, axis=-1, keepdims=True)
    s = jnp.sum(e * tcols, axis=-1, keepdims=True)

    per_row = _masked_row_loss(z, s, i * tile_n, tn, n_valid)
    out_ref[...] = _lane_dense_partial(jnp.sum(per_row))


def _vmem_estimate(tile_n, c, pred_itemsize, t_itemsize, use_gather):
    lanes_c = _round_up(c, 128)
    pred_buf = 2 * tile_n * lanes_c * pred_itemsize      # double-buffered pred
    interm = 3 * tile_n * lanes_c * 4                    # x, e, corrected (f32)
    out_buf = 2 * 8 * 128 * 4
    if use_gather:
        side = 2 * tile_n * lanes_c * t_itemsize         # tcols double-buffer
    else:
        side = (_round_up(c, 8) * lanes_c * t_itemsize   # resident T, single buffer
                + 2 * tile_n * 128 * 4)                  # lane-padded int32 targets
    return pred_buf + interm + out_buf + side


def forward_corrected_loss(pred, target, T, *, gather_threshold: int = 1024):
    """pred: [N, C] float, target: [N] int, T: [C, C] float -> scalar float32."""
    n, c = pred.shape
    target = target.astype(jnp.int32)
    use_gather = c >= gather_threshold

    pred_itemsize = jnp.dtype(pred.dtype).itemsize
    t_itemsize = jnp.dtype(T.dtype).itemsize
    sub = _sublane_multiple(pred.dtype)
    lanes_c = _round_up(c, 128)

    # ~2 MiB of pred per buffer, rounded down to the sublane packing, capped.
    tile_n = max(sub, (_TARGET_BLOCK_BYTES // (lanes_c * pred_itemsize)) // sub * sub)
    tile_n = min(tile_n, _MAX_TILE_ROWS)
    # Keep >= 4 grid steps when N allows: feeds the DMA pipeline and lets
    # v7x's two TensorCores split the "parallel" axis.
    if n >= 4 * sub:
        tile_n = min(tile_n, _round_up(pl.cdiv(n, 4), sub))
    # Shrink until the explicit VMEM footprint fits the budget.
    while (tile_n > sub and
           _vmem_estimate(tile_n, c, pred_itemsize, t_itemsize, use_gather)
           > _VMEM_BUDGET_BYTES):
        tile_n = max(sub, (tile_n // 2) // sub * sub)
    if tile_n >= n:
        tile_n = n   # single block covering all rows ("block == full dim" rule)
    grid_n = pl.cdiv(n, tile_n)

    vmem_limit = int(min(
        64 * 1024 * 1024,
        max(32 * 1024 * 1024,
            _vmem_estimate(tile_n, c, pred_itemsize, t_itemsize, use_gather)
            + 8 * 1024 * 1024)))

    compiler_params = pltpu.CompilerParams(
        dimension_semantics=("parallel",),
        vmem_limit_bytes=vmem_limit,
    )
    out_shape = jax.ShapeDtypeStruct((grid_n, 1, 128), jnp.float32)
    out_spec = pl.BlockSpec((1, 1, 128), lambda i: (i, 0, 0))
    pred_spec = pl.BlockSpec((tile_n, c), lambda i: (i, 0))

    if use_gather:
        # Gather the needed T column per row once in the wrapper:
        # Tcols[i, j] = T[j, target_i].  Avoids the O(N*C^2) matmul for large C.
        tcols = jnp.take(T.T, target, axis=0)             # [N, C]
        kernel = functools.partial(_fwd_loss_gather_kernel, n_valid=n, tile_n=tile_n)
        partials = pl.pallas_call(
            kernel,
            out_shape=out_shape,
            grid=(grid_n,),
            in_specs=[pred_spec,
                      pl.BlockSpec((tile_n, c), lambda i: (i, 0))],
            out_specs=out_spec,
            compiler_params=compiler_params,
        )(pred, tcols)
    else:
        kernel = functools.partial(_fwd_loss_matmul_kernel, n_valid=n, tile_n=tile_n)
        partials = pl.pallas_call(
            kernel,
            out_shape=out_shape,
            grid=(grid_n,),
            in_specs=[
                pred_spec,
                # (tile_n, 1) int32 targets: lane-pads in VMEM but the payload is
                # tiny; accepted per review and accounted for in the VMEM budget.
                pl.BlockSpec((tile_n, 1), lambda i: (i, 0)),
                # T: whole-array resident VMEM copy (single buffer, no per-step
                # DMA or upcast).
                pl.BlockSpec(memory_space=pltpu.MemorySpace.VMEM),
            ],
            out_specs=out_spec,
            compiler_params=compiler_params,
        )(pred, target.reshape(n, 1), T)

    return jnp.sum(partials)


def _reference(pred, target, T):
    # Pure-JAX reference mirroring the PyTorch forward.
    probs = jax.nn.softmax(pred.astype(jnp.float32), axis=1)
    corrected = probs @ T.astype(jnp.float32)
    picked = jnp.take_along_axis(corrected, target[:, None].astype(jnp.int32), axis=1)
    return -jnp.sum(jnp.log(picked))


def _make_T(c, eps=0.2, dtype=jnp.float32):
    # Deterministic row-stochastic transition matrix (symmetric-noise model),
    # standing in for the List[List[float]] passed to __init__.
    return ((1.0 - eps) * jnp.eye(c, dtype=jnp.float32)
            + (eps / c) * jnp.ones((c, c), dtype=jnp.float32)).astype(dtype)


if __name__ == "__main__":
    key = jax.random.PRNGKey(0)
    k1, k2, k3, k4 = jax.random.split(key, 4)

    # Primary small-shape example consistent with the module: N=8 rows, C=4 classes.
    N, C = 8, 4
    pred = jax.random.normal(k1, (N, C), dtype=jnp.float32)
    target = jax.random.randint(k2, (N,), 0, C, dtype=jnp.int32)
    T = _make_T(C)

    loss = jax.block_until_ready(forward_corrected_loss(pred, target, T))
    ref = _reference(pred, target, T)
    assert jnp.allclose(loss, ref, rtol=1e-5, atol=1e-4), (loss, ref)

    # Multi-tile case with a ragged last row-tile (exercises in-kernel row
    # masking with no wrapper padding), MXU matmul path.
    N2, C2 = 70, 12
    pred2 = jax.random.normal(k3, (N2, C2), dtype=jnp.float32)
    target2 = jax.random.randint(k4, (N2,), 0, C2, dtype=jnp.int32)
    T2 = _make_T(C2)

    loss2 = jax.block_until_ready(forward_corrected_loss(pred2, target2, T2))
    ref2 = _reference(pred2, target2, T2)
    assert jnp.allclose(loss2, ref2, rtol=1e-5, atol=1e-4), (loss2, ref2)

    # Same data through the large-C (target-column gather) path.
    loss3 = jax.block_until_ready(
        forward_corrected_loss(pred2, target2, T2, gather_threshold=1))
    assert jnp.allclose(loss3, ref2, rtol=1e-5, atol=1e-4), (loss3, ref2)

    print("KERNEL_OK")
</pallas_src>

<mosaic_0001>
module attributes {stable_mosaic.version = 11 : i64} {
  func.func @_fwd_loss_matmul_kernel(%arg0: i32, %arg1: memref<8x4xf32, #tpu.memory_space<vmem>>, %arg2: memref<8x1xi32, #tpu.memory_space<vmem>>, %arg3: memref<4x4xf32, #tpu.memory_space<vmem>>, %arg4: memref<1x1x128xf32, #tpu.memory_space<vmem>>) attributes {dimension_semantics = [#tpu.dimension_semantics<parallel>], iteration_bounds = array<i64: 1>, scalar_prefetch = 0 : i64, scratch_operands = 0 : i64, tpu.core_type = #tpu.core_type<tc>, window_params = [{transform_indices = @transform_0, window_bounds = array<i64: 8, 4>}, {transform_indices = @transform_1, window_bounds = array<i64: 8, 1>}, {pipeline_mode = #tpu.pipeline_mode<synchronous>, transform_indices = @transform_2, window_bounds = array<i64: 4, 4>}, {transform_indices = @transform_3, window_bounds = array<i64: 1, 1, 128>}]} {
    %c0 = arith.constant 0 : index
    %c0_0 = arith.constant 0 : index
    %0 = vector.load %arg1[%c0, %c0_0] : memref<8x4xf32, #tpu.memory_space<vmem>>, vector<8x4xf32>
    %c0_1 = arith.constant 0 : index
    %c0_2 = arith.constant 0 : index
    %1 = vector.load %arg2[%c0_1, %c0_2] : memref<8x1xi32, #tpu.memory_space<vmem>>, vector<8x1xi32>
    %cst = arith.constant dense<0xFF800000> : vector<8xf32>
    %2 = vector.multi_reduction <maximumf>, %0, %cst [1] : vector<8x4xf32> to vector<8xf32>
    %3 = vector.shape_cast %2 : vector<8xf32> to vector<8x1xf32>
    %4 = vector.broadcast %3 : vector<8x1xf32> to vector<8x4xf32>
    %5 = arith.subf %0, %4 : vector<8x4xf32>
    %6 = math.exp %5 : vector<8x4xf32>
    %cst_3 = arith.constant dense<0.000000e+00> : vector<8xf32>
    %7 = vector.multi_reduction <add>, %6, %cst_3 [1] : vector<8x4xf32> to vector<8xf32>
    %8 = vector.shape_cast %7 : vector<8xf32> to vector<8x1xf32>
    %c0_4 = arith.constant 0 : index
    %c0_5 = arith.constant 0 : index
    %9 = vector.load %arg3[%c0_4, %c0_5] : memref<4x4xf32, #tpu.memory_space<vmem>>, vector<4x4xf32>
    %cst_6 = arith.constant dense<0.000000e+00> : vector<8x4xf32>
    %10 = tpu.matmul %6, %9, %cst_6 {dimension_numbers = #tpu.dot_dimension_numbers<[1], [0], [0], [1], [0, 0, 1, 1], [], []>} : vector<8x4xf32>, vector<4x4xf32>, vector<8x4xf32> -> vector<8x4xf32>
    %11 = tpu.iota {dimensions = array<i32: 1>} : vector<8x4xi32>
    %12 = vector.broadcast %1 : vector<8x1xi32> to vector<8x4xi32>
    %13 = arith.cmpi eq, %11, %12 : vector<8x4xi32>
    %cst_7 = arith.constant 0.000000e+00 : f32
    %14 = vector.broadcast %cst_7 : f32 to vector<8x4xf32>
    %15 = arith.select %13, %10, %14 : vector<8x4xi1>, vector<8x4xf32>
    %cst_8 = arith.constant dense<0.000000e+00> : vector<8xf32>
    %16 = vector.multi_reduction <add>, %15, %cst_8 [1] : vector<8x4xf32> to vector<8xf32>
    %17 = vector.shape_cast %16 : vector<8xf32> to vector<8x1xf32>
    %c8_i32 = arith.constant 8 : i32
    %18 = arith.muli %arg0, %c8_i32 : i32
    %19 = tpu.iota {dimensions = array<i32: 0>} : vector<8x1xi32>
    %20 = vector.broadcast %18 : i32 to vector<8x1xi32>
    %21 = arith.addi %19, %20 : vector<8x1xi32>
    %c8_i32_9 = arith.constant 8 : i32
    %22 = vector.broadcast %c8_i32_9 : i32 to vector<8x1xi32>
    %23 = arith.cmpi slt, %21, %22 : vector<8x1xi32>
    %cst_10 = arith.constant 1.000000e+00 : f32
    %24 = vector.broadcast %cst_10 : f32 to vector<8x1xf32>
    %25 = arith.select %23, %8, %24 : vector<8x1xi1>, vector<8x1xf32>
    %cst_11 = arith.constant 1.000000e+00 : f32
    %26 = vector.broadcast %cst_11 : f32 to vector<8x1xf32>
    %27 = arith.select %23, %17, %26 : vector<8x1xi1>, vector<8x1xf32>
    %28 = math.log %25 : vector<8x1xf32>
    %29 = math.log %27 : vector<8x1xf32>
    %30 = arith.subf %28, %29 : vector<8x1xf32>
    %cst_12 = arith.constant 0.000000e+00 : f32
    %31 = vector.broadcast %cst_12 : f32 to vector<8x1xf32>
    %32 = arith.select %23, %30, %31 : vector<8x1xi1>, vector<8x1xf32>
    %33 = vector.shape_cast %32 : vector<8x1xf32> to vector<1x8x1xf32>
    %cst_13 = arith.constant dense<0.000000e+00> : vector<1xf32>
    %34 = vector.multi_reduction <add>, %33, %cst_13 [1, 2] : vector<1x8x1xf32> to vector<1xf32>
    %35 = vector.shape_cast %34 : vector<1xf32> to vector<1x1x1xf32>
    %36 = vector.extract %35[0, 0, 0] : f32 from vector<1x1x1xf32>
    %37 = tpu.iota {dimensions = array<i32: 2>} : vector<1x1x128xi32>
    %c0_i32 = arith.constant 0 : i32
    %38 = vector.broadcast %c0_i32 : i32 to vector<1x1x128xi32>
    %39 = arith.cmpi eq, %37, %38 : vector<1x1x128xi32>
    %cst_14 = arith.constant 0.000000e+00 : f32
    %40 = vector.broadcast %36 : f32 to vector<1x1x128xf32>
    %41 = vector.broadcast %cst_14 : f32 to vector<1x1x128xf32>
    %42 = arith.select %39, %40, %41 : vector<1x1x128xi1>, vector<1x1x128xf32>
    %c0_15 = arith.constant 0 : index
    %c0_16 = arith.constant 0 : index
    %c0_17 = arith.constant 0 : index
    %43 = vector.load %arg4[%c0_15, %c0_16, %c0_17] : memref<1x1x128xf32, #tpu.memory_space<vmem>>, vector<1x1x128xf32>
    tpu.vector_store %arg4[%c0_15, %c0_16, %c0_17], %42 {strides = array<i32>} : memref<1x1x128xf32, #tpu.memory_space<vmem>>, vector<1x1x128xf32>,
    return
  }
  func.func @transform_0(%arg0: i32) -> (i32, i32) {
    %c0_i32 = arith.constant 0 : i32
    %c0_i32_0 = arith.constant 0 : i32
    return %arg0, %c0_i32 : i32, i32
  }
  func.func @transform_1(%arg0: i32) -> (i32, i32) {
    %c0_i32 = arith.constant 0 : i32
    %c0_i32_0 = arith.constant 0 : i32
    return %arg0, %c0_i32 : i32, i32
  }
  func.func @transform_2(%arg0: i32) -> (i32, i32) {
    %c0_i32 = arith.constant 0 : i32
    %c0_i32_0 = arith.constant 0 : i32
    %c0_i32_1 = arith.constant 0 : i32
    return %c0_i32, %c0_i32_0 : i32, i32
  }
  func.func @transform_3(%arg0: i32) -> (i32, i32, i32) {
    %c0_i32 = arith.constant 0 : i32
    %c0_i32_0 = arith.constant 0 : i32
    %c0_i32_1 = arith.constant 0 : i32
    return %arg0, %c0_i32, %c0_i32_0 : i32, i32, i32
  }
}

</mosaic_0001>

<bundles_post_ra>
// kernel: tpu_custom_call.1
= control target key start
LH: loop header
LB: loop body
LE: loop exit
PB: predicated region body
PF: predicated region fallthrough
CT: control target
= control target key end

     0   :  { %vm17_vm0 = vcmask 31744   ;;  %s242_s0 = inlined_call_operand.vmem [shape: f32[8,4], index: 0, kind: input, shape index: {}]   ;;  %s243_s1 = inlined_call_operand.vmem [shape: s32[8,1], index: 1, kind: input, shape index: {}]   ;;  %s244_s2 = inlined_call_operand.vmem [shape: f32[4,4], index: 2, kind: input, shape index: {}]   ;;  %s245_s3 = inlined_call_operand.hbm [shape: f32[1,1,128], index: 3, kind: output, shape index: {}]  }
   0x1   :  { %v15_v0 = vld [vmem:[%s242_s0] sm:$0xff] }
   0x2   :  { %8 = vsyncpa [#allocation3], 0  ;;  %v18_v1 = vsel %vm17_vm0, %v15_v0, -inf  ;;  %v27_v2 = vld [vmem:[%s244_s2] sm:$0xf]  ;;  %vm31_vm1 = vcmask 1043456   ;;  %v105_v11 = vlaneseq }
   0x3   :  { %19 = vmax.xlane.f32.xlu0 %v18_v1  ;;  %v202_v3 = vmov 0.0   ;;  %vm203_vm2 = vmmov 0   ;;  %v16_v4 = vld [vmem:[%s243_s1] sm:$0xff]  ;;  %v204_v5 = vmov 0   ;;  %vm129_vm4 = vcmask 7168   ;;  %s205_s0 = smov [#allocation2]  }
   0x4   :  { %162 = vmatprep.subr.mxu0 %v202_v3  ;;  %164 = vmatprep.mubr.msk.f32.mxu0 %vm203_vm2, %v202_v3  ;;  %v106_v12 = vand.u32 127, %v105_v11  ;;  %s150_s1 = sshll.u32 %s205_s0, 4  ;;  %s151_s1 = int_to_ptr.vmem [resolvable:$true] %s150_s1 }
   0x5   :  { %163 = vmatpush3.msk.msra.mxu0 %vm31_vm1, %v27_v2  ;;  %173 = vset.pattern.permute.xlu0 %v204_v5  ;;  %s180_s18 = scalar_lea.vmem %s151_s1, 16  ;;  %s184_s19 = scalar_lea.vmem %s151_s1, 32 }
   0x6   :  { %vm140_vm5 = vcmp.eq.s32.totalorder %v106_v12, 0  ;;  %p181_p0 = scmp.ne.s32.totalorder %s151_s1, %s180_s18  ;;  %p185_p1 = scmp.lt.s32.totalorder %s151_s1, %s151_s1 }
   0x7   :  { %p186_p2 = scmp.lt.s32.totalorder %s184_s19, %s180_s18 }
   0x9   :  { %p187_p3 = por %p186_p2, %p185_p1 }
   0xb   :  { %p188_p4 = pnand %p187_p3, %p181_p0 }
  0x19   :  { %108 = vperm.xlu0 %173, %v16_v4  }
  0x8c   :  { %v20_v6 = vpop.xlane.xlu0 %19 }
  0x8d   :  { %v21_v7 = vsub.f32 %v15_v0, %v20_v6 }
  0x8f   :  { %v22_v8 = vmul.f32 1.442695, %v21_v7 }
  0x91   :  { %174 = vpow2.f32 %v22_v8 }
  0x94   :  { %v109_v13 = vpop.permute.xlu0 %108 }
  0x95   :  { %vm110_vm3 = vcmp.eq.s32.totalorder %v106_v12, %v109_v13 }
  0x9e   :  { %v175_v9 = vpop.eup %174 }
  0x9f   :  { %165 = vmatmul.mubr.msk.f32.vlgmr.msra.gmra.mxu0 %vm17_vm0, %v175_v9  ;;  %v24_v10 = vsel %vm17_vm0, %v175_v9, 0.0 }
  0xa0   :  { %25 = vadd.xlane.f32.xlu1 %v24_v10 }
 0x129   :  { %v26_v18 = vpop.xlane.xlu1 %25 }
 0x12a   :  { %176 = vlog2.f32 %v26_v18 }
 0x137   :  { %v177_v20 = vpop.eup %176 }
 0x138   :  { %v124_v22 = vmul.f32 0.6931472, %v177_v20 }
 0x15f   :  { %v101_v14 = vpop.f32.mrf.mxu0 }
 0x160   :  { %v111_v15 = vsel %vm110_vm3, %v101_v14, 0.0 }
 0x161   :  { %v166_v16 = vpop.f32.mrf.mxu0  ;;  %v112_v17 = vsel %vm17_vm0, %v111_v15, 0.0 }
 0x162   :  { %113 = vadd.xlane.f32.xlu1 %v112_v17 }
 0x1eb   :  { %v114_v19 = vpop.xlane.xlu1 %113 }
 0x1ec   :  { %178 = vlog2.f32 %v114_v19 }
 0x1f9   :  { %v179_v21 = vpop.eup %178 }
 0x1fa   :  { %v126_v23 = vmul.f32 0.6931472, %v179_v21 }
 0x1fc   :  { %v127_v24 = vsub.f32 %v124_v22, %v126_v23 }
 0x1fe   :  { %v130_v25 = vsel %vm129_vm4, %v127_v24, 0.0 }
 0x1ff   :  { %131 = vadd.xlane.f32.xlu1 %v130_v25 }
 0x288   :  { %v132_v26 = vpop.xlane.xlu1 %131 }
 0x289   :  { %v133_v27 = vrot.slane %v132_v26, 4 }
 0x28b   :  { %v134_v28 = vadd.f32 %v133_v27, %v132_v26 }
 0x28d   :  { %v135_v29 = vrot.slane %v134_v28, 2 }
 0x28f   :  { %v136_v30 = vadd.f32 %v135_v29, %v134_v28 }
 0x291   :  { %v137_v31 = vrot.slane %v136_v30, 1 }
 0x293   :  { %v138_v32 = vadd.f32 %v137_v31, %v136_v30 }
 0x295   :  { %167 = vpush %v138_v32 }
 0x2c6   :  { %s168_s2 = spop %167 }
 0x2c7   :  { %v141_v33 = vstv %s168_s2 }
 0x2c8   :  { %v142_v34 = vsel %vm140_vm5, %v141_v33, 0.0 }
 0x2c9   :  { %143 = vst [vmem:[#allocation2] sm:$0x1] %v142_v34 }
 0x2ca   :  { %191 = shalt.err (!%p188_p4)
}
 0x2cb   :  { %153 = dma.vmem_to_hbm [thread:$0]  %s151_s1, 16, %s245_s3, [#allocation3]  }
 0x2cc   :  { %200 = dma.done.wait [#allocation3], 16  }
 0x2cd   :  { %201 = vsyncadd [#allocation3], 4294967280 }
 0x2ce   :  { %157 = vsyncpa [#allocation3], 1 }

</bundles_post_ra>
